<compile_context>
chip_gen: v7x
topology: tpu7x:2x2x1
jax: 0.10.0
libtpu: 0.0.40
codegen_flags: <defaults>
</compile_context>

<pallas_src>
import functools

import jax
import jax.numpy as jnp
from jax.experimental import pallas as pl
from jax.experimental.pallas import tpu as pltpu

EPS = 1e-8
LANE = 128


def dpb_v8_kernel(biases_ref, w_ref, vecs_ref, o_ref, *, pos_dim, outdim, residual):
    inv_sqrt_d = pos_dim ** -0.5

    # pos_proj: Linear(1 -> D). Transposed layout: x_t[d, n] = w0[d]*b[n] + b0[d].
    b_row = biases_ref[...]                 # (1, Nb)
    w0_col = vecs_ref[:, 0:1]               # (D, 1)
    b0_col = vecs_ref[:, 1:2]               # (D, 1)
    x = w0_col * b_row + b0_col             # (D, Nb)

    def rms_relu(x):
        # SimpleRMSNorm over the feature axis (axis 0 in transposed layout), then ReLU.
        ss = jnp.sum(x * x, axis=0, keepdims=True)        # (1, Nb)
        rms = jnp.sqrt(ss) * inv_sqrt_d
        inv = pl.reciprocal(rms + EPS, approx=False)      # EUP; exact to hold 1e-4 tol
        return jnp.maximum(x * inv, 0.0)

    # 3 x [RMSNorm -> ReLU -> Linear(D, D)] with optional residual.
    for i in range(3):
        h = rms_relu(x)
        w_t = w_ref[i]                                    # (D, D) = W_i^T (torch orientation)
        b_col = vecs_ref[:, 2 + i:3 + i]                  # (D, 1)
        y = jnp.dot(w_t, h, preferred_element_type=jnp.float32) + b_col
        x = y + x if residual else y

    # out head: RMSNorm -> ReLU -> Linear(D -> O).
    h = rms_relu(x)
    wo_t = w_ref[3][:outdim, :]                           # (O, D) = Wo^T
    bo_col = vecs_ref[:outdim, 5:6]                       # (O, 1)
    yo = jnp.dot(wo_t, h, preferred_element_type=jnp.float32) + bo_col
    o_ref[...] = yo.astype(o_ref.dtype)                   # (O, Nb), lane-dense store


def pack_params(params, *, pos_dim, outdim):
    """One-time packing (do this at model init, not per call): 11 arrays -> 2."""
    D, O = pos_dim, outdim
    wo_padded = jnp.zeros((D, D), jnp.float32).at[:O, :].set(params["wo"].T)
    w_stack = jnp.stack([params["w1"].T, params["w2"].T, params["w3"].T, wo_padded])  # (4, D, D)

    def col(v):
        v = v.reshape(-1).astype(jnp.float32)
        return jnp.zeros((D,), jnp.float32).at[: v.shape[0]].set(v)

    vecs = jnp.stack(
        [col(params["w0"]), col(params["b0"]),
         col(params["b1"]), col(params["b2"]), col(params["b3"]),
         col(params["bo"])],
        axis=1,
    )                                                                                  # (D, 6)
    return {"w_stack": w_stack, "vecs": vecs}


def dynamic_pos_bias_v8(biases, packed, *, pos_dim, outdim, residual=True,
                        max_block_n=2048):
    """biases: (N, 1) float32. packed: output of pack_params. Returns (N, outdim)."""
    N = biases.shape[0]

    # Lane-tile N: pad up to a multiple of the tile so every block is full.
    n128 = ((N + LANE - 1) // LANE) * LANE
    block_n = min(max_block_n, n128)
    n_pad = ((n128 + block_n - 1) // block_n) * block_n

    biases_t = biases.reshape(1, N).astype(jnp.float32)   # free reshape (N,1)->(1,N)
    if n_pad != N:
        biases_t = jnp.pad(biases_t, ((0, 0), (0, n_pad - N)))

    kernel = functools.partial(dpb_v8_kernel, pos_dim=pos_dim, outdim=outdim,
                               residual=residual)
    out_t = pl.pallas_call(
        kernel,
        out_shape=jax.ShapeDtypeStruct((outdim, n_pad), jnp.float32),
        grid=(n_pad // block_n,),
        in_specs=[
            pl.BlockSpec((1, block_n), lambda i: (0, i)),               # biases tile
            pl.BlockSpec((4, pos_dim, pos_dim), lambda i: (0, 0, 0)),   # weights, resident
            pl.BlockSpec((pos_dim, 6), lambda i: (0, 0)),               # vecs, resident
        ],
        out_specs=pl.BlockSpec((outdim, block_n), lambda i: (0, i)),
        compiler_params=pltpu.CompilerParams(dimension_semantics=("parallel",)),
    )(biases_t, packed["w_stack"], packed["vecs"])

    # Drop padding, transpose back so callers see the PyTorch layout (N, O).
    return out_t[:, :N].T


# ---------------------------------------------------------------------------
# Reference + test harness
# ---------------------------------------------------------------------------
def _reference(biases, params, *, pos_dim, residual=True):
    x = biases * params["w0"] + params["b0"]

    def block(x, w, b):
        norm = jnp.sqrt(jnp.sum(x * x, axis=-1, keepdims=True))
        xn = x / (norm * (pos_dim ** -0.5) + EPS)
        return jnp.maximum(xn, 0.0) @ w + b

    for i in (1, 2, 3):
        y = block(x, params[f"w{i}"], params[f"b{i}"])
        x = y + x if residual else y
    return block(x, params["wo"], params["bo"])


def make_params(key, pos_dim, outdim):
    ks = jax.random.split(key, 10)

    def lin(kw, fan_in, shape_w, shape_b):
        s = 1.0 / (fan_in ** 0.5)
        w = jax.random.uniform(kw, shape_w, jnp.float32, -s, s)
        b = jax.random.uniform(jax.random.fold_in(kw, 1), shape_b, jnp.float32, -s, s)
        return w, b

    p = {}
    p["w0"], p["b0"] = lin(ks[0], 1, (1, pos_dim), (1, pos_dim))
    p["w1"], p["b1"] = lin(ks[1], pos_dim, (pos_dim, pos_dim), (1, pos_dim))
    p["w2"], p["b2"] = lin(ks[2], pos_dim, (pos_dim, pos_dim), (1, pos_dim))
    p["w3"], p["b3"] = lin(ks[3], pos_dim, (pos_dim, pos_dim), (1, pos_dim))
    p["wo"], p["bo"] = lin(ks[4], pos_dim, (pos_dim, outdim), (1, outdim))
    return p


if __name__ == "__main__":
    pos_dim = 32      # dim
    outdim = 16       # outdim (e.g. num heads)
    N = 128           # number of relative-position entries
    residual = True

    key = jax.random.PRNGKey(0)
    kb, kp = jax.random.split(key)
    biases = jax.random.normal(kb, (N, 1), jnp.float32)
    params = make_params(kp, pos_dim, outdim)
    packed = pack_params(params, pos_dim=pos_dim, outdim=outdim)

    out = dynamic_pos_bias_v8(biases, packed, pos_dim=pos_dim,
                              outdim=outdim, residual=residual)
    out = jax.block_until_ready(out)

    ref = _reference(biases, params, pos_dim=pos_dim, residual=residual)
    assert out.shape == (N, outdim)
    assert jnp.allclose(out, ref, atol=1e-4, rtol=1e-4), "mismatch vs JAX reference"

    # Also exercise a non-aligned, larger N to verify the tiled / padded path.
    N2 = 300
    biases2 = jax.random.normal(jax.random.fold_in(kb, 7), (N2, 1), jnp.float32)
    out2 = jax.block_until_ready(
        dynamic_pos_bias_v8(biases2, packed, pos_dim=pos_dim,
                            outdim=outdim, residual=residual))
    ref2 = _reference(biases2, params, pos_dim=pos_dim, residual=residual)
    assert out2.shape == (N2, outdim)
    assert jnp.allclose(out2, ref2, atol=1e-4, rtol=1e-4), "mismatch (tiled path)"

    print("KERNEL_OK")
</pallas_src>

<mosaic_0001>
module attributes {stable_mosaic.version = 11 : i64} {
  func.func @dpb_v8_kernel(%arg0: i32, %arg1: memref<1x128xf32, #tpu.memory_space<vmem>>, %arg2: memref<4x32x32xf32, #tpu.memory_space<vmem>>, %arg3: memref<32x6xf32, #tpu.memory_space<vmem>>, %arg4: memref<16x128xf32, #tpu.memory_space<vmem>>) attributes {dimension_semantics = [#tpu.dimension_semantics<parallel>], iteration_bounds = array<i64: 1>, scalar_prefetch = 0 : i64, scratch_operands = 0 : i64, tpu.core_type = #tpu.core_type<tc>, window_params = [{transform_indices = @transform_0, window_bounds = array<i64: 1, 128>}, {pipeline_mode = #tpu.pipeline_mode<synchronous>, transform_indices = @transform_1, window_bounds = array<i64: 4, 32, 32>}, {pipeline_mode = #tpu.pipeline_mode<synchronous>, transform_indices = @transform_2, window_bounds = array<i64: 32, 6>}, {transform_indices = @transform_3, window_bounds = array<i64: 16, 128>}]} {
    %c0 = arith.constant 0 : index
    %c0_0 = arith.constant 0 : index
    %0 = vector.load %arg1[%c0, %c0_0] : memref<1x128xf32, #tpu.memory_space<vmem>>, vector<1x128xf32>
    %c0_1 = arith.constant 0 : index
    %c0_2 = arith.constant 0 : index
    %1 = vector.load %arg3[%c0_1, %c0_2] : memref<32x6xf32, #tpu.memory_space<vmem>>, vector<32x1xf32>
    %c0_3 = arith.constant 0 : index
    %c1 = arith.constant 1 : index
    %2 = vector.load %arg3[%c0_3, %c1] : memref<32x6xf32, #tpu.memory_space<vmem>>, vector<32x1xf32>
    %3 = vector.broadcast %1 : vector<32x1xf32> to vector<32x128xf32>
    %4 = vector.broadcast %0 : vector<1x128xf32> to vector<32x128xf32>
    %5 = arith.mulf %3, %4 : vector<32x128xf32>
    %6 = vector.broadcast %2 : vector<32x1xf32> to vector<32x128xf32>
    %7 = arith.addf %5, %6 : vector<32x128xf32>
    %8 = arith.mulf %7, %7 : vector<32x128xf32>
    %cst = arith.constant dense<0.000000e+00> : vector<128xf32>
    %9 = vector.multi_reduction <add>, %8, %cst [0] : vector<32x128xf32> to vector<128xf32>
    %10 = vector.shape_cast %9 : vector<128xf32> to vector<1x128xf32>
    %11 = math.sqrt %10 : vector<1x128xf32>
    %cst_4 = arith.constant 0.176776692 : f32
    %12 = vector.broadcast %cst_4 : f32 to vector<1x128xf32>
    %13 = arith.mulf %11, %12 : vector<1x128xf32>
    %cst_5 = arith.constant 9.99999993E-9 : f32
    %14 = vector.broadcast %cst_5 : f32 to vector<1x128xf32>
    %15 = arith.addf %13, %14 : vector<1x128xf32>
    %16 = tpu.reciprocal %15 : vector<1x128xf32> -> vector<1x128xf32>
    %17 = vector.broadcast %16 : vector<1x128xf32> to vector<32x128xf32>
    %18 = arith.mulf %7, %17 : vector<32x128xf32>
    %cst_6 = arith.constant 0.000000e+00 : f32
    %19 = vector.broadcast %cst_6 : f32 to vector<32x128xf32>
    %20 = arith.maximumf %18, %19 : vector<32x128xf32>
    %c0_7 = arith.constant 0 : index
    %c0_8 = arith.constant 0 : index
    %c0_9 = arith.constant 0 : index
    %21 = vector.load %arg2[%c0_7, %c0_8, %c0_9] : memref<4x32x32xf32, #tpu.memory_space<vmem>>, vector<1x32x32xf32>
    %22 = vector.shape_cast %21 : vector<1x32x32xf32> to vector<32x32xf32>
    %c0_10 = arith.constant 0 : index
    %c2 = arith.constant 2 : index
    %23 = vector.load %arg3[%c0_10, %c2] : memref<32x6xf32, #tpu.memory_space<vmem>>, vector<32x1xf32>
    %cst_11 = arith.constant dense<0.000000e+00> : vector<32x128xf32>
    %24 = tpu.matmul %22, %20, %cst_11 {dimension_numbers = #tpu.dot_dimension_numbers<[1], [0], [0], [1], [0, 0, 1, 1], [], []>} : vector<32x32xf32>, vector<32x128xf32>, vector<32x128xf32> -> vector<32x128xf32>
    %25 = vector.broadcast %23 : vector<32x1xf32> to vector<32x128xf32>
    %26 = arith.addf %24, %25 : vector<32x128xf32>
    %27 = arith.addf %26, %7 : vector<32x128xf32>
    %28 = arith.mulf %27, %27 : vector<32x128xf32>
    %cst_12 = arith.constant dense<0.000000e+00> : vector<128xf32>
    %29 = vector.multi_reduction <add>, %28, %cst_12 [0] : vector<32x128xf32> to vector<128xf32>
    %30 = vector.shape_cast %29 : vector<128xf32> to vector<1x128xf32>
    %31 = math.sqrt %30 : vector<1x128xf32>
    %cst_13 = arith.constant 0.176776692 : f32
    %32 = vector.broadcast %cst_13 : f32 to vector<1x128xf32>
    %33 = arith.mulf %31, %32 : vector<1x128xf32>
    %cst_14 = arith.constant 9.99999993E-9 : f32
    %34 = vector.broadcast %cst_14 : f32 to vector<1x128xf32>
    %35 = arith.addf %33, %34 : vector<1x128xf32>
    %36 = tpu.reciprocal %35 : vector<1x128xf32> -> vector<1x128xf32>
    %37 = vector.broadcast %36 : vector<1x128xf32> to vector<32x128xf32>
    %38 = arith.mulf %27, %37 : vector<32x128xf32>
    %cst_15 = arith.constant 0.000000e+00 : f32
    %39 = vector.broadcast %cst_15 : f32 to vector<32x128xf32>
    %40 = arith.maximumf %38, %39 : vector<32x128xf32>
    %c1_16 = arith.constant 1 : index
    %c0_17 = arith.constant 0 : index
    %c0_18 = arith.constant 0 : index
    %41 = vector.load %arg2[%c1_16, %c0_17, %c0_18] : memref<4x32x32xf32, #tpu.memory_space<vmem>>, vector<1x32x32xf32>
    %42 = vector.shape_cast %41 : vector<1x32x32xf32> to vector<32x32xf32>
    %c0_19 = arith.constant 0 : index
    %c3 = arith.constant 3 : index
    %43 = vector.load %arg3[%c0_19, %c3] : memref<32x6xf32, #tpu.memory_space<vmem>>, vector<32x1xf32>
    %cst_20 = arith.constant dense<0.000000e+00> : vector<32x128xf32>
    %44 = tpu.matmul %42, %40, %cst_20 {dimension_numbers = #tpu.dot_dimension_numbers<[1], [0], [0], [1], [0, 0, 1, 1], [], []>} : vector<32x32xf32>, vector<32x128xf32>, vector<32x128xf32> -> vector<32x128xf32>
    %45 = vector.broadcast %43 : vector<32x1xf32> to vector<32x128xf32>
    %46 = arith.addf %44, %45 : vector<32x128xf32>
    %47 = arith.addf %46, %27 : vector<32x128xf32>
    %48 = arith.mulf %47, %47 : vector<32x128xf32>
    %cst_21 = arith.constant dense<0.000000e+00> : vector<128xf32>
    %49 = vector.multi_reduction <add>, %48, %cst_21 [0] : vector<32x128xf32> to vector<128xf32>
    %50 = vector.shape_cast %49 : vector<128xf32> to vector<1x128xf32>
    %51 = math.sqrt %50 : vector<1x128xf32>
    %cst_22 = arith.constant 0.176776692 : f32
    %52 = vector.broadcast %cst_22 : f32 to vector<1x128xf32>
    %53 = arith.mulf %51, %52 : vector<1x128xf32>
    %cst_23 = arith.constant 9.99999993E-9 : f32
    %54 = vector.broadcast %cst_23 : f32 to vector<1x128xf32>
    %55 = arith.addf %53, %54 : vector<1x128xf32>
    %56 = tpu.reciprocal %55 : vector<1x128xf32> -> vector<1x128xf32>
    %57 = vector.broadcast %56 : vector<1x128xf32> to vector<32x128xf32>
    %58 = arith.mulf %47, %57 : vector<32x128xf32>
    %cst_24 = arith.constant 0.000000e+00 : f32
    %59 = vector.broadcast %cst_24 : f32 to vector<32x128xf32>
    %60 = arith.maximumf %58, %59 : vector<32x128xf32>
    %c2_25 = arith.constant 2 : index
    %c0_26 = arith.constant 0 : index
    %c0_27 = arith.constant 0 : index
    %61 = vector.load %arg2[%c2_25, %c0_26, %c0_27] : memref<4x32x32xf32, #tpu.memory_space<vmem>>, vector<1x32x32xf32>
    %62 = vector.shape_cast %61 : vector<1x32x32xf32> to vector<32x32xf32>
    %c0_28 = arith.constant 0 : index
    %c4 = arith.constant 4 : index
    %63 = vector.load %arg3[%c0_28, %c4] : memref<32x6xf32, #tpu.memory_space<vmem>>, vector<32x1xf32>
    %cst_29 = arith.constant dense<0.000000e+00> : vector<32x128xf32>
    %64 = tpu.matmul %62, %60, %cst_29 {dimension_numbers = #tpu.dot_dimension_numbers<[1], [0], [0], [1], [0, 0, 1, 1], [], []>} : vector<32x32xf32>, vector<32x128xf32>, vector<32x128xf32> -> vector<32x128xf32>
    %65 = vector.broadcast %63 : vector<32x1xf32> to vector<32x128xf32>
    %66 = arith.addf %64, %65 : vector<32x128xf32>
    %67 = arith.addf %66, %47 : vector<32x128xf32>
    %68 = arith.mulf %67, %67 : vector<32x128xf32>
    %cst_30 = arith.constant dense<0.000000e+00> : vector<128xf32>
    %69 = vector.multi_reduction <add>, %68, %cst_30 [0] : vector<32x128xf32> to vector<128xf32>
    %70 = vector.shape_cast %69 : vector<128xf32> to vector<1x128xf32>
    %71 = math.sqrt %70 : vector<1x128xf32>
    %cst_31 = arith.constant 0.176776692 : f32
    %72 = vector.broadcast %cst_31 : f32 to vector<1x128xf32>
    %73 = arith.mulf %71, %72 : vector<1x128xf32>
    %cst_32 = arith.constant 9.99999993E-9 : f32
    %74 = vector.broadcast %cst_32 : f32 to vector<1x128xf32>
    %75 = arith.addf %73, %74 : vector<1x128xf32>
    %76 = tpu.reciprocal %75 : vector<1x128xf32> -> vector<1x128xf32>
    %77 = vector.broadcast %76 : vector<1x128xf32> to vector<32x128xf32>
    %78 = arith.mulf %67, %77 : vector<32x128xf32>
    %cst_33 = arith.constant 0.000000e+00 : f32
    %79 = vector.broadcast %cst_33 : f32 to vector<32x128xf32>
    %80 = arith.maximumf %78, %79 : vector<32x128xf32>
    %c3_34 = arith.constant 3 : index
    %c0_35 = arith.constant 0 : index
    %c0_36 = arith.constant 0 : index
    %81 = vector.load %arg2[%c3_34, %c0_35, %c0_36] : memref<4x32x32xf32, #tpu.memory_space<vmem>>, vector<1x32x32xf32>
    %82 = vector.shape_cast %81 : vector<1x32x32xf32> to vector<32x32xf32>
    %83 = vector.extract_strided_slice %82 {offsets = [0, 0], sizes = [16, 32], strides = [1, 1]} : vector<32x32xf32> to vector<16x32xf32>
    %c0_37 = arith.constant 0 : index
    %c5 = arith.constant 5 : index
    %84 = vector.load %arg3[%c0_37, %c5] : memref<32x6xf32, #tpu.memory_space<vmem>>, vector<16x1xf32>
    %cst_38 = arith.constant dense<0.000000e+00> : vector<16x128xf32>
    %85 = tpu.matmul %83, %80, %cst_38 {dimension_numbers = #tpu.dot_dimension_numbers<[1], [0], [0], [1], [0, 0, 1, 1], [], []>} : vector<16x32xf32>, vector<32x128xf32>, vector<16x128xf32> -> vector<16x128xf32>
    %86 = vector.broadcast %84 : vector<16x1xf32> to vector<16x128xf32>
    %87 = arith.addf %85, %86 : vector<16x128xf32>
    %c0_39 = arith.constant 0 : index
    %c0_40 = arith.constant 0 : index
    %88 = vector.load %arg4[%c0_39, %c0_40] : memref<16x128xf32, #tpu.memory_space<vmem>>, vector<16x128xf32>
    tpu.vector_store %arg4[%c0_39, %c0_40], %87 {strides = array<i32>} : memref<16x128xf32, #tpu.memory_space<vmem>>, vector<16x128xf32>,
    return
  }
  func.func @transform_0(%arg0: i32) -> (i32, i32) {
    %c0_i32 = arith.constant 0 : i32
    %c0_i32_0 = arith.constant 0 : i32
    return %c0_i32, %arg0 : i32, i32
  }
  func.func @transform_1(%arg0: i32) -> (i32, i32, i32) {
    %c0_i32 = arith.constant 0 : i32
    %c0_i32_0 = arith.constant 0 : i32
    %c0_i32_1 = arith.constant 0 : i32
    %c0_i32_2 = arith.constant 0 : i32
    return %c0_i32, %c0_i32_0, %c0_i32_1 : i32, i32, i32
  }
  func.func @transform_2(%arg0: i32) -> (i32, i32) {
    %c0_i32 = arith.constant 0 : i32
    %c0_i32_0 = arith.constant 0 : i32
    %c0_i32_1 = arith.constant 0 : i32
    return %c0_i32, %c0_i32_0 : i32, i32
  }
  func.func @transform_3(%arg0: i32) -> (i32, i32) {
    %c0_i32 = arith.constant 0 : i32
    %c0_i32_0 = arith.constant 0 : i32
    return %c0_i32, %arg0 : i32, i32
  }
}

</mosaic_0001>

<bundles_post_ra>
// kernel: tpu_custom_call.1
= control target key start
LH: loop header
LB: loop body
LE: loop exit
PB: predicated region body
PF: predicated region fallthrough
CT: control target
= control target key end

     0   :  { %8 = vsyncpa [#allocation3], 0  ;;  %s1098_s0 = inlined_call_operand.vmem [shape: f32[1,128], index: 0, kind: input, shape index: {}]   ;;  %s1099_s1 = inlined_call_operand.hbm [shape: f32[4,32,32], index: 1, kind: input, shape index: {}]   ;;  %s1100_s2 = inlined_call_operand.vmem [shape: f32[32,6], index: 2, kind: input, shape index: {}]   ;;  %s1101_s3 = inlined_call_operand.hbm [shape: f32[16,128], index: 3, kind: output, shape index: {}]  }
   0x1   :  { %9 = vsyncpa [#allocation4], 0  ;;  %s907_s12 = smov [#allocation2]   ;;  %s859_s16 = scalar_lea.hbm %s1099_s1, 2048 }
   0x2   :  { %s17_s13 = sshll.u32 %s907_s12, 4  ;;  %p860_p0 = scmp.ne.s32.totalorder %s1099_s1, %s859_s16  ;;  %s18_s13 = int_to_ptr.vmem [resolvable:$true] %s17_s13 }
   0x3   :  { %p863_p1 = scmp.lt.u32.totalorder %s859_s16, %s1099_s1 }
   0x5   :  { %p865_p2 = pnand %p863_p1, %p860_p0 }
   0x7   :  { %868 = shalt.err (!%p865_p2)
}
   0x8   :  { %s869_s21 = scalar_lea.vmem %s18_s13, 2048  ;;  %p874_p4 = scmp.lt.s32.totalorder %s18_s13, %s18_s13 }
   0x9   :  { %p870_p3 = scmp.ne.s32.totalorder %s18_s13, %s869_s21  ;;  %p875_p5 = scmp.lt.s32.totalorder %s869_s21, %s869_s21 }
   0xb   :  { %p876_p6 = por %p875_p5, %p874_p4 }
   0xd   :  { %p877_p7 = pnand %p876_p6, %p870_p3 }
   0xf   :  { %880 = shalt.err (!%p877_p7)
}
  0x10   :  { %s908_s22 = smov 128   ;;  %s909_s23 = smov 8  }
  0x11   :  { %23 = dma.hbm_to_vmem [thread:$0]  %s1099_s1, 2048, %s18_s13, [#allocation3], %s908_s22, %s908_s22, %s909_s23  }
  0x12   :  { %903 = dma.done.wait [#allocation3], 2048  }
  0x13   :  { %904 = vsyncadd [#allocation3], 4294965248  ;;  %v910_v0 = vmov 0   ;;  %v955_v1 = vld [vmem:[%s1100_s2 + $0x10] sm:$0xff]  ;;  %v960_v2 = vld [vmem:[%s1100_s2] sm:$0xff]  ;;  %v911_v4 = vmov 1  }
  0x14   :  { %830 = vset.pattern.permute.xlu1 %v910_v0  ;;  %829 = vset.pattern.permute.xlu0 %v910_v0  ;;  %v967_v3 = vld [vmem:[%s1100_s2 + $0x8] sm:$0xff]  ;;  %v974_v5 = vld [vmem:[%s1100_s2 + $0x18] sm:$0xff]  ;;  %v115_v6 = vld [vmem:[#allocation2] sm:$0xff]  ;;  %vm135_vm0 = vcmask 261120   ;;  %v912_v7 = vmov 2   ;;  %v913_v60 = vmov 3  }
  0x15   :  { %46 = vperm.xlu1 %830, %v955_v1   ;;  %36 = vperm.xlu0 %829, %v960_v2   ;;  %v689_v12 = vld [vmem:[%s1098_s0] ss:$0 sm:$0xff]  ;;  %v116_v56 = vld [vmem:[#allocation2 + $0x8] sm:$0xff]  ;;  %v117_v57 = vld [vmem:[#allocation2 + $0x10] sm:$0xff]  ;;  %s916_s0 = smov [#allocation5]  }
  0x16   :  { %742 = vmatprep.mubr.msk.f32.mxu0 %vm135_vm0, %v115_v6  ;;  %v118_v58 = vld [vmem:[#allocation2 + $0x18] sm:$0xff]  ;;  %v269_v59 = vld [vmem:[#allocation2 + $0x20] sm:$0xff]  ;;  %s677_s7 = sshll.u32 %s916_s0, 4  ;;  %s678_s7 = int_to_ptr.vmem [resolvable:$true] %s677_s7 }
  0x17   :  { %756 = vmatprep.mubr.msk.f32.mxu1 %vm135_vm0, %v269_v59  ;;  %s881_s8 = scalar_lea.vmem %s678_s7, 256  ;;  %p886_p9 = scmp.lt.s32.totalorder %s678_s7, %s678_s7 }
  0x18   :  { %p882_p8 = scmp.ne.s32.totalorder %s678_s7, %s881_s8  ;;  %p887_p10 = scmp.lt.s32.totalorder %s881_s8, %s881_s8 }
  0x19   :  { %831 = vset.pattern.permute.xlu1 %v911_v4  ;;  %41 = vperm.xlu0 %829, %v967_v3  }
  0x1a   :  { %65 = vperm.xlu1 %831, %v960_v2   ;;  %p888_p11 = por %p887_p10, %p886_p9 }
  0x1c   :  { %p889_p12 = pnand %p888_p11, %p882_p8 }
  0x1d   :  { %832 = vset.pattern.permute.xlu0 %v911_v4 }
  0x1e   :  { %833 = vset.pattern.permute.xlu1 %v910_v0  ;;  %69 = vperm.xlu0 %832, %v967_v3  }
  0x1f   :  { %51 = vperm.xlu1 %833, %v974_v5  }
  0x22   :  { %77 = vperm.xlu0 %832, %v974_v5  }
  0x23   :  { %834 = vset.pattern.permute.xlu1 %v911_v4 }
  0x24   :  { %73 = vperm.xlu1 %834, %v955_v1  }
  0x26   :  { %836 = vset.pattern.permute.xlu0 %v912_v7 }
  0x27   :  { %124 = vperm.xlu0 %836, %v967_v3  }
  0x28   :  { %835 = vset.pattern.permute.xlu1 %v912_v7 }
  0x29   :  { %120 = vperm.xlu1 %835, %v960_v2  }
  0x2b   :  { %837 = vset.pattern.permute.xlu0 %v913_v60 }
  0x2c   :  { %274 = vperm.xlu0 %837, %v960_v2  }
  0x2d   :  { %128 = vperm.xlu1 %835, %v955_v1  }
  0x30   :  { %286 = vperm.xlu0 %837, %v974_v5  }
  0x31   :  { %132 = vperm.xlu1 %835, %v974_v5  }
  0x35   :  { %838 = vset.pattern.permute.xlu1 %v913_v60 }
  0x36   :  { %278 = vperm.xlu1 %838, %v967_v3  }
  0x3a   :  { %282 = vperm.xlu1 %838, %v955_v1  }
  0x94   :  { %v47_v8 = vpop.permute.xlu1 %46  ;;  %v37_v9 = vpop.permute.xlu0 %36 }
  0x95   :  { %v60_v13 = vmul.f32 %v689_v12, %v37_v9  ;;  %v62_v21 = vmul.f32 %v689_v12, %v47_v8 }
  0x98   :  { %v42_v10 = vpop.permute.xlu0 %41 }
  0x99   :  { %v66_v11 = vpop.permute.xlu1 %65  ;;  %v61_v14 = vmul.f32 %v689_v12, %v42_v10 }
  0x9a   :  { %v990_v18 = vadd.f32 %v66_v11, %v60_v13 }
  0x9c   :  { %v84_v24 = vmul.f32 %v990_v18, %v990_v18 }
  0x9d   :  { %v70_v15 = vpop.permute.xlu0 %69 }
  0x9e   :  { %v988_v16 = vadd.f32 %v70_v15, %v61_v14  ;;  %v52_v17 = vpop.permute.xlu1 %51 }
  0x9f   :  { %v63_v19 = vmul.f32 %v689_v12, %v52_v17 }
  0xa0   :  { %v85_v22 = vmul.f32 %v988_v16, %v988_v16 }
  0xa1   :  { %v78_v20 = vpop.permute.xlu0 %77 }
  0xa2   :  { %v996_v25 = vadd.f32 %v78_v20, %v63_v19  ;;  %v88_v27 = vadd.f32 %v85_v22, %v84_v24 }
  0xa3   :  { %v74_v23 = vpop.permute.xlu1 %73 }
  0xa4   :  { %v998_v26 = vadd.f32 %v74_v23, %v62_v21  ;;  %v87_v29 = vmul.f32 %v996_v25, %v996_v25 }
  0xa6   :  { %v86_v28 = vmul.f32 %v998_v26, %v998_v26  ;;  %v125_v63 = vpop.permute.xlu0 %124 }
  0xa8   :  { %v89_v30 = vadd.f32 %v88_v27, %v86_v28  ;;  %v121_v61 = vpop.permute.xlu1 %120 }
  0xaa   :  { %v90_v31 = vadd.f32 %v89_v30, %v87_v29 }
  0xac   :  { %v91_v32 = vrot.slane %v90_v31, 4  ;;  %v129_v62 = vpop.permute.xlu1 %128 }
  0xae   :  { %v92_v33 = vadd.f32 %v91_v32, %v90_v31 }
  0xb0   :  { %v93_v34 = vrot.slane %v92_v33, 2  ;;  %v133_v9 = vpop.permute.xlu1 %132 }
  0xb2   :  { %v94_v35 = vadd.f32 %v93_v34, %v92_v33 }
  0xb4   :  { %v95_v36 = vrot.slane %v94_v35, 1 }
  0xb6   :  { %v96_v37 = vadd.f32 %v95_v36, %v94_v35 }
  0xb8   :  { %843 = vrsqrt.f32 %v96_v37  ;;  %vm99_vm1 = vcmp.eq.f32.partialorder %v96_v37, inf  ;;  %v102_v40 = vand.u32 2147483648, %v96_v37  ;;  %vm101_vm2 = vcmp.eq.f32.partialorder %v96_v37, 0.0 }
  0xc2   :  { %v844_v38 = vpop.eup %843 }
  0xc3   :  { %v98_v39 = vmul.f32 %v844_v38, %v96_v37 }
  0xc5   :  { %v100_v41 = vsel %vm99_vm1, %v96_v37, %v98_v39 }
  0xc6   :  { %v103_v42 = vsel %vm101_vm2, %v102_v40, %v100_v41 }
  0xc7   :  { %v104_v43 = vmul.f32 0.17677669, %v103_v42 }
  0xc9   :  { %v105_v44 = vadd.f32 1e-08, %v104_v43 }
  0xcb   :  { %845 = vrcp.f32 %v105_v44 }
  0xd5   :  { %v846_v45 = vpop.eup %845 }
  0xd6   :  { %v109_v46 = vmul.f32 %v846_v45, %v998_v26  ;;  %v107_v47 = vmul.f32 %v846_v45, %v990_v18  ;;  %v108_v48 = vmul.f32 %v846_v45, %v988_v16  ;;  %v110_v49 = vmul.f32 %v846_v45, %v996_v25 }
  0xd8   :  { %v113_v50 = vmax.f32 %v109_v46, 0.0  ;;  %v111_v51 = vmax.f32 %v107_v47, 0.0  ;;  %v112_v52 = vmax.f32 %v108_v48, 0.0  ;;  %v114_v53 = vmax.f32 %v110_v49, 0.0  ;;  %v270_v48 = vld [vmem:[#allocation2 + $0x28] sm:$0xff]  ;;  %v271_v49 = vld [vmem:[#allocation2 + $0x30] sm:$0xff] }
  0xda   :  { %v787_v54 = vpack.c.bf16 %v112_v52, %v111_v51  ;;  %v791_v55 = vpack.c.bf16 %v114_v53, %v113_v50  ;;  %v272_v50 = vld [vmem:[#allocation2 + $0x38] sm:$0xff]  ;;  %v422_v51 = vld [vmem:[#allocation2 + $0x40] sm:$0xff]  ;;  %v914_v52 = vmov 4   ;;  %v275_v53 = vpop.permute.xlu0 %274 }
  0xdb   :  { %839 = vset.pattern.permute.xlu1 %v914_v52  ;;  %840 = vset.pattern.permute.xlu0 %v914_v52 }
  0xdc   :  { %788 = vmatprep.subr.bf16.mxu0 %v787_v54  ;;  %427 = vperm.xlu1 %839, %v960_v2  }
  0xdd   :  { %790 = vmatpush3.bf16.msra.mxu0 %v787_v54  ;;  %431 = vperm.xlu0 %840, %v967_v3   ;;  %v279_v54 = vpop.permute.xlu1 %278 }
  0xde   :  { %792 = vmatprep.subr.bf16.mxu0 %v791_v55  ;;  %v287_v59 = vpop.permute.xlu0 %286 }
  0xe0   :  { %435 = vperm.xlu1 %839, %v955_v1  }
  0xe1   :  { %794 = vmatpush3.bf16.msra.mxu0 %v791_v55 }
  0xe4   :  { %743 = vmatmul.mubr.msk.f32.vlgmr.msra.gmra.mrb[0].mxu0 %vm135_vm0, %v116_v56  ;;  %439 = vperm.xlu1 %839, %v974_v5  }
  0xe5   :  { %745 = vmatprep.mubr.msk.f32.mxu0 %vm135_vm0, %v117_v57 }
  0xe8   :  { %746 = vmatmul.mubr.msk.f32.gmra.mrb[2].mxu0 %vm135_vm0, %v118_v58 }
  0xe9   :  { %770 = vmatprep.mubr.msk.f32.mxu0 %vm135_vm0, %v422_v51 }
 0x1b7   :  { %v744_v0 = vpop.f32.mrb[0].mxu0 }
 0x1b8   :  { %v220_v4 = vadd.f32 %v744_v0, %v125_v63  ;;  %v214_v6 = vpop.f32.mrb[1].mxu0  ;;  %v283_v63 = vpop.permute.xlu1 %282 }
 0x1b9   :  { %v215_v7 = vadd.f32 %v214_v6, %v121_v61 }
 0x1ba   :  { %v1017_v8 = vadd.f32 %v220_v4, %v988_v16 }
 0x1bb   :  { %v1020_v10 = vadd.f32 %v215_v7, %v990_v18  ;;  %v747_v11 = vpop.f32.mrb[2].mxu0 }
 0x1bc   :  { %v230_v12 = vadd.f32 %v747_v11, %v133_v9  ;;  %v224_v13 = vpop.f32.mrb[3].mxu0  ;;  %v238_v14 = vmul.f32 %v1017_v8, %v1017_v8 }
 0x1bd   :  { %v237_v15 = vmul.f32 %v1020_v10, %v1020_v10  ;;  %v225_v17 = vadd.f32 %v224_v13, %v129_v62 }
 0x1be   :  { %v1027_v19 = vadd.f32 %v230_v12, %v996_v25 }
 0x1bf   :  { %v1030_v16 = vadd.f32 %v225_v17, %v998_v26  ;;  %v241_v20 = vadd.f32 %v238_v14, %v237_v15 }
 0x1c0   :  { %v240_v21 = vmul.f32 %v1027_v19, %v1027_v19 }
 0x1c1   :  { %v239_v18 = vmul.f32 %v1030_v16, %v1030_v16 }
 0x1c3   :  { %v242_v22 = vadd.f32 %v241_v20, %v239_v18 }
 0x1c5   :  { %v243_v23 = vadd.f32 %v242_v22, %v240_v21 }
 0x1c7   :  { %v244_v24 = vrot.slane %v243_v23, 4 }
 0x1c9   :  { %v245_v27 = vadd.f32 %v244_v24, %v243_v23 }
 0x1cb   :  { %v246_v28 = vrot.slane %v245_v27, 2 }
 0x1cd   :  { %v247_v29 = vadd.f32 %v246_v28, %v245_v27 }
 0x1cf   :  { %v248_v30 = vrot.slane %v247_v29, 1 }
 0x1d1   :  { %v249_v31 = vadd.f32 %v248_v30, %v247_v29 }
 0x1d3   :  { %847 = vrsqrt.f32 %v249_v31  ;;  %vm252_vm3 = vcmp.eq.f32.partialorder %v249_v31, inf  ;;  %v255_v26 = vand.u32 2147483648, %v249_v31  ;;  %vm254_vm4 = vcmp.eq.f32.partialorder %v249_v31, 0.0 }
 0x1dd   :  { %v848_v25 = vpop.eup %847 }
 0x1de   :  { %v251_v32 = vmul.f32 %v848_v25, %v249_v31 }
 0x1e0   :  { %v253_v33 = vsel %vm252_vm3, %v249_v31, %v251_v32 }
 0x1e1   :  { %v256_v34 = vsel %vm254_vm4, %v255_v26, %v253_v33 }
 0x1e2   :  { %v257_v35 = vmul.f32 0.17677669, %v256_v34 }
 0x1e4   :  { %v258_v36 = vadd.f32 1e-08, %v257_v35 }
 0x1e6   :  { %849 = vrcp.f32 %v258_v36 }
 0x1f0   :  { %v850_v37 = vpop.eup %849 }
 0x1f1   :  { %v260_v38 = vmul.f32 %v850_v37, %v1020_v10  ;;  %v261_v39 = vmul.f32 %v850_v37, %v1017_v8  ;;  %v262_v40 = vmul.f32 %v850_v37, %v1030_v16  ;;  %v263_v41 = vmul.f32 %v850_v37, %v1027_v19 }
 0x1f3   :  { %v264_v42 = vmax.f32 %v260_v38, 0.0  ;;  %v265_v43 = vmax.f32 %v261_v39, 0.0  ;;  %v266_v44 = vmax.f32 %v262_v40, 0.0  ;;  %v267_v45 = vmax.f32 %v263_v41, 0.0  ;;  %v423_v38 = vld [vmem:[#allocation2 + $0x48] sm:$0xff]  ;;  %v424_v39 = vld [vmem:[#allocation2 + $0x50] sm:$0xff] }
 0x1f4   :  { %v425_v40 = vld [vmem:[#allocation2 + $0x58] sm:$0xff]  ;;  %v575_v41 = vld [vmem:[#allocation2 + $0x60] sm:$0xff] }
 0x1f5   :  { %v795_v46 = vpack.c.bf16 %v265_v43, %v264_v42  ;;  %v799_v47 = vpack.c.bf16 %v267_v45, %v266_v44  ;;  %v915_v42 = vmov 5   ;;  %v428_v43 = vpop.permute.xlu1 %427  ;;  %v432_v45 = vpop.permute.xlu0 %431 }
 0x1f6   :  { %842 = vset.pattern.permute.xlu1 %v915_v42  ;;  %841 = vset.pattern.permute.xlu0 %v915_v42 }
 0x1f7   :  { %796 = vmatprep.subr.bf16.mxu1 %v795_v46  ;;  %586 = vperm.xlu1 %842, %v967_v3  }
 0x1f8   :  { %798 = vmatpush3.bf16.msra.mxu1 %v795_v46  ;;  %581 = vperm.xlu0 %841, %v960_v2  }
 0x1f9   :  { %800 = vmatprep.subr.bf16.mxu1 %v799_v47  ;;  %v436_v44 = vpop.permute.xlu1 %435 }
 0x1fc   :  { %802 = vmatpush3.bf16.msra.mxu1 %v799_v47 }
 0x1fd   :  { %v440_v51 = vpop.permute.xlu1 %439 }
 0x1ff   :  { %757 = vmatmul.mubr.msk.f32.vlgmr.msra.gmra.mrb[0].mxu1 %vm135_vm0, %v270_v48 }
 0x200   :  { %759 = vmatprep.mubr.msk.f32.mxu1 %vm135_vm0, %v271_v49 }
 0x203   :  { %760 = vmatmul.mubr.msk.f32.gmra.mrb[2].mxu1 %vm135_vm0, %v272_v50 }
 0x204   :  { %784 = vmatprep.mubr.msk.f32.mxu1 %vm135_vm0, %v575_v41 }
 0x2d2   :  { %v758_v55 = vpop.f32.mrb[0].mxu1 }
 0x2d3   :  { %v373_v56 = vadd.f32 %v758_v55, %v279_v54  ;;  %v367_v57 = vpop.f32.mrb[1].mxu1 }
 0x2d4   :  { %v368_v58 = vadd.f32 %v367_v57, %v275_v53 }
 0x2d5   :  { %v1049_v60 = vadd.f32 %v373_v56, %v1017_v8 }
 0x2d6   :  { %v1052_v61 = vadd.f32 %v368_v58, %v1020_v10  ;;  %v761_v62 = vpop.f32.mrb[2].mxu1 }
 0x2d7   :  { %v383_v0 = vadd.f32 %v761_v62, %v287_v59  ;;  %v377_v4 = vpop.f32.mrb[3].mxu1  ;;  %v391_v1 = vmul.f32 %v1049_v60, %v1049_v60 }
 0x2d8   :  { %v390_v5 = vmul.f32 %v1052_v61, %v1052_v61  ;;  %v378_v6 = vadd.f32 %v377_v4, %v283_v63 }
 0x2d9   :  { %v1059_v7 = vadd.f32 %v383_v0, %v1027_v19 }
 0x2da   :  { %v1062_v8 = vadd.f32 %v378_v6, %v1030_v16  ;;  %v394_v9 = vadd.f32 %v391_v1, %v390_v5 }
 0x2db   :  { %v393_v11 = vmul.f32 %v1059_v7, %v1059_v7 }
 0x2dc   :  { %v392_v10 = vmul.f32 %v1062_v8, %v1062_v8 }
 0x2de   :  { %v395_v12 = vadd.f32 %v394_v9, %v392_v10 }
 0x2e0   :  { %v396_v13 = vadd.f32 %v395_v12, %v393_v11 }
 0x2e2   :  { %v397_v14 = vrot.slane %v396_v13, 4 }
 0x2e4   :  { %v398_v15 = vadd.f32 %v397_v14, %v396_v13 }
 0x2e6   :  { %v399_v17 = vrot.slane %v398_v15, 2 }
 0x2e8   :  { %v400_v20 = vadd.f32 %v399_v17, %v398_v15 }
 0x2ea   :  { %v401_v18 = vrot.slane %v400_v20, 1 }
 0x2ec   :  { %v402_v21 = vadd.f32 %v401_v18, %v400_v20 }
 0x2ee   :  { %851 = vrsqrt.f32 %v402_v21  ;;  %vm405_vm5 = vcmp.eq.f32.partialorder %v402_v21, inf  ;;  %v408_v16 = vand.u32 2147483648, %v402_v21  ;;  %vm407_vm6 = vcmp.eq.f32.partialorder %v402_v21, 0.0 }
 0x2f8   :  { %v852_v19 = vpop.eup %851 }
 0x2f9   :  { %v404_v22 = vmul.f32 %v852_v19, %v402_v21 }
 0x2fb   :  { %v406_v23 = vsel %vm405_vm5, %v402_v21, %v404_v22 }
 0x2fc   :  { %v409_v24 = vsel %vm407_vm6, %v408_v16, %v406_v23 }
 0x2fd   :  { %v410_v27 = vmul.f32 0.17677669, %v409_v24 }
 0x2ff   :  { %v411_v28 = vadd.f32 1e-08, %v410_v27 }
 0x301   :  { %853 = vrcp.f32 %v411_v28  ;;  %v576_v28 = vld [vmem:[#allocation2 + $0x68] sm:$0xff] }
 0x30b   :  { %v854_v29 = vpop.eup %853 }
 0x30c   :  { %v413_v30 = vmul.f32 %v854_v29, %v1052_v61  ;;  %v414_v31 = vmul.f32 %v854_v29, %v1049_v60  ;;  %v415_v25 = vmul.f32 %v854_v29, %v1062_v8  ;;  %v416_v32 = vmul.f32 %v854_v29, %v1059_v7  ;;  %v587_v29 = vpop.permute.xlu1 %586 }
 0x30e   :  { %v417_v26 = vmax.f32 %v413_v30, 0.0  ;;  %v418_v33 = vmax.f32 %v414_v31, 0.0  ;;  %v419_v34 = vmax.f32 %v415_v25, 0.0  ;;  %v420_v35 = vmax.f32 %v416_v32, 0.0  ;;  %v582_v30 = vpop.permute.xlu0 %581 }
 0x310   :  { %v803_v36 = vpack.c.bf16 %v418_v33, %v417_v26  ;;  %v807_v37 = vpack.c.bf16 %v420_v35, %v419_v34 }
 0x312   :  { %804 = vmatprep.subr.bf16.mxu0 %v803_v36 }
 0x313   :  { %806 = vmatpush3.bf16.msra.mxu0 %v803_v36 }
 0x314   :  { %808 = vmatprep.subr.bf16.mxu0 %v807_v37 }
 0x317   :  { %810 = vmatpush3.bf16.msra.mxu0 %v807_v37 }
 0x31a   :  { %771 = vmatmul.mubr.msk.f32.vlgmr.msra.gmra.mrb[4].mxu0 %vm135_vm0, %v423_v38 }
 0x31b   :  { %773 = vmatprep.mubr.msk.f32.mxu0 %vm135_vm0, %v424_v39 }
 0x31e   :  { %774 = vmatmul.mubr.msk.f32.gmra.mrb[6].mxu0 %vm135_vm0, %v425_v40 }
 0x3ed   :  { %v772_v46 = vpop.f32.mrb[4].mxu0 }
 0x3ee   :  { %v526_v47 = vadd.f32 %v772_v46, %v432_v45  ;;  %v520_v48 = vpop.f32.mrb[5].mxu0 }
 0x3ef   :  { %v521_v49 = vadd.f32 %v520_v48, %v428_v43 }
 0x3f0   :  { %v540_v50 = vadd.f32 %v526_v47, %v1049_v60 }
 0x3f1   :  { %v539_v52 = vadd.f32 %v521_v49, %v1052_v61  ;;  %v775_v53 = vpop.f32.mrb[6].mxu0 }
 0x3f2   :  { %v544_v54 = vmul.f32 %v540_v50, %v540_v50  ;;  %v536_v55 = vadd.f32 %v775_v53, %v440_v51  ;;  %v530_v56 = vpop.f32.mrb[7].mxu0 }
 0x3f3   :  { %v543_v57 = vmul.f32 %v539_v52, %v539_v52  ;;  %v531_v3 = vadd.f32 %v530_v56, %v436_v44 }
 0x3f4   :  { %v542_v2 = vadd.f32 %v536_v55, %v1059_v7 }
 0x3f5   :  { %v547_v58 = vadd.f32 %v544_v54, %v543_v57  ;;  %v541_v59 = vadd.f32 %v531_v3, %v1062_v8 }
 0x3f6   :  { %v546_v63 = vmul.f32 %v542_v2, %v542_v2 }
 0x3f7   :  { %v545_v62 = vmul.f32 %v541_v59, %v541_v59 }
 0x3f9   :  { %v548_v0 = vadd.f32 %v547_v58, %v545_v62 }
 0x3fb   :  { %v549_v4 = vadd.f32 %v548_v0, %v546_v63 }
 0x3fd   :  { %v550_v1 = vrot.slane %v549_v4, 4 }
 0x3ff   :  { %v551_v60 = vadd.f32 %v550_v1, %v549_v4 }
 0x401   :  { %v552_v5 = vrot.slane %v551_v60, 2 }
 0x403   :  { %v553_v6 = vadd.f32 %v552_v5, %v551_v60 }
 0x405   :  { %v554_v61 = vrot.slane %v553_v6, 1 }
 0x407   :  { %v555_v9 = vadd.f32 %v554_v61, %v553_v6 }
 0x409   :  { %855 = vrsqrt.f32 %v555_v9  ;;  %vm558_vm7 = vcmp.eq.f32.partialorder %v555_v9, inf  ;;  %v561_v12 = vand.u32 2147483648, %v555_v9  ;;  %vm560_vm8 = vcmp.eq.f32.partialorder %v555_v9, 0.0 }
 0x413   :  { %v856_v10 = vpop.eup %855 }
 0x414   :  { %v557_v11 = vmul.f32 %v856_v10, %v555_v9 }
 0x416   :  { %v559_v13 = vsel %vm558_vm7, %v555_v9, %v557_v11 }
 0x417   :  { %v562_v7 = vsel %vm560_vm8, %v561_v12, %v559_v13 }
 0x418   :  { %v563_v14 = vmul.f32 0.17677669, %v562_v7 }
 0x41a   :  { %v564_v8 = vadd.f32 1e-08, %v563_v14 }
 0x41c   :  { %857 = vrcp.f32 %v564_v8 }
 0x426   :  { %v858_v15 = vpop.eup %857 }
 0x427   :  { %v568_v17 = vmul.f32 %v858_v15, %v541_v59  ;;  %v566_v20 = vmul.f32 %v858_v15, %v539_v52  ;;  %v567_v18 = vmul.f32 %v858_v15, %v540_v50  ;;  %v569_v21 = vmul.f32 %v858_v15, %v542_v2 }
 0x429   :  { %v572_v19 = vmax.f32 %v568_v17, 0.0  ;;  %v570_v22 = vmax.f32 %v566_v20, 0.0  ;;  %v571_v16 = vmax.f32 %v567_v18, 0.0  ;;  %v573_v23 = vmax.f32 %v569_v21, 0.0 }
 0x42b   :  { %v811_v24 = vpack.c.bf16 %v571_v16, %v570_v22  ;;  %v815_v27 = vpack.c.bf16 %v573_v23, %v572_v19 }
 0x42d   :  { %812 = vmatprep.subr.bf16.mxu1 %v811_v24 }
 0x42e   :  { %814 = vmatpush3.bf16.msra.mxu1 %v811_v24 }
 0x42f   :  { %816 = vmatprep.subr.bf16.mxu1 %v815_v27 }
 0x432   :  { %818 = vmatpush3.bf16.msra.mxu1 %v815_v27 }
 0x435   :  { %785 = vmatmul.mubr.msk.f32.vlgmr.msra.gmra.mrb[4].mxu1 %vm135_vm0, %v576_v28 }
 0x508   :  { %v786_v31 = vpop.f32.mrb[4].mxu1 }
 0x509   :  { %v667_v25 = vadd.f32 %v786_v31, %v587_v29  ;;  %v661_v32 = vpop.f32.mrb[5].mxu1 }
 0x50a   :  { %v662_v26 = vadd.f32 %v661_v32, %v582_v30 }
 0x50b   :  { %671 = vst [vmem:[#allocation5 + $0x8] sm:$0xff] %v667_v25 }
 0x50c   :  { %670 = vst [vmem:[#allocation5] sm:$0xff] %v662_v26 }
 0x50d   :  { %892 = shalt.err (!%p889_p12)
}
 0x50e   :  { %s893_s11 = scalar_lea.hbm %s1101_s3, 256 }
 0x50f   :  { %p894_p13 = scmp.ne.s32.totalorder %s1101_s3, %s893_s11  ;;  %p897_p0 = scmp.lt.u32.totalorder %s893_s11, %s1101_s3 }
 0x511   :  { %p899_p1 = pnand %p897_p0, %p894_p13 }
 0x513   :  { %902 = shalt.err (!%p899_p1)
}
 0x514   :  { %683 = dma.vmem_to_hbm [thread:$0]  %s678_s7, 256, %s1101_s3, [#allocation4], %s908_s22, %s908_s22, %s909_s23  }
 0x515   :  { %905 = dma.done.wait [#allocation4], 256  }
 0x516   :  { %906 = vsyncadd [#allocation4], 4294967040 }
 0x517   :  { %687 = vsyncpa [#allocation3], 1 }
 0x518   :  { %688 = vsyncpa [#allocation4], 1 }

</bundles_post_ra>
